<compile_context>
chip_gen: v7x
topology: tpu7x:2x2x1
jax: 0.10.0
libtpu: 0.0.40
codegen_flags: <defaults>
</compile_context>

<pallas_src>
import functools

import numpy as np
import jax
import jax.numpy as jnp
from jax.experimental import pallas as pl
from jax.experimental.pallas import tpu as pltpu


def _round_up(x, m):
    return ((x + m - 1) // m) * m


def _tiled_bytes(rows, cols, dtype):
    """VMEM footprint of a (rows, cols) slab including internal (sublane, lane)
    tile padding (8 sublanes for 4-byte dtypes, 16 for 2-byte, 32 for 1-byte)."""
    d = jnp.dtype(dtype)
    sub = 8 * max(1, 4 // d.itemsize)
    return _round_up(max(rows, 1), sub) * _round_up(max(cols, 1), 128) * d.itemsize


def _vmem_capacity_bytes():
    try:
        cap = getattr(pltpu.get_tpu_info(), "vmem_capacity_bytes", None)
        if cap:
            return int(cap)
    except Exception:
        pass
    return 64 * 1024 * 1024  # conservative default (v7x per-TensorCore size)


def _choose_p_tile(P, per_p_bytes, budget_bytes):
    """Pick a divisor of P as the spatial tile.  Prefer >= 4 grid steps and an
    even step count (pipelining + v7x 2-TC sharding), then the largest tile
    that fits the VMEM budget."""
    divisors = [d for d in range(1, P + 1) if P % d == 0]
    fitting = [d for d in divisors if d * per_p_bytes <= budget_bytes] or [1]

    def rank(d):
        steps = P // d
        return (steps >= 4, steps % 2 == 0, d)

    return max(fitting, key=rank)


def _lc_kernel(patch_ref, w_ref, b_ref, o_ref, *, batch, cat):
    # patch_ref: (Pt, N, CKK)    w_ref: (Pt, OC, CKK)
    # b_ref:     (Pt, cat, OC)   o_ref: (Pt, N, OC)      N = batch * cat
    acc = jnp.einsum('pnc,poc->pno', patch_ref[...], w_ref[...],
                     preferred_element_type=jnp.float32)        # (Pt, N, OC) f32
    bias = b_ref[...].astype(jnp.float32)                       # (Pt, cat, OC)
    if batch == 1:
        out = acc + bias
    else:
        pt, n, oc = acc.shape
        # Broadcast bias over the batch dim: output row n = b*cat + k uses bias
        # row k.  Sublane-split reshape + broadcast add (no materialized
        # concatenate of a (Pt, N, OC) copy).
        out = (acc.reshape(pt, batch, cat, oc) + bias[:, None]).reshape(pt, n, oc)
    o_ref[...] = out.astype(o_ref.dtype)


def local2d_forward(x, weight, bias, *, stride=1, padding=0,
                    compute_dtype=jnp.bfloat16, vmem_budget_bytes=None):
    """Locally-connected 2D forward, matching Local2d.forward.

    compute_dtype: dtype of the two large matmul operands (default bf16 — the
    kernel is HBM-streaming bound, so halving those bytes is ~2x end-to-end);
    accumulation and the bias add stay in f32.  Pass jnp.float32 (or None) for
    exact f32 math.
    """
    batch, cat, C, H, W = x.shape
    OC, h_out, w_out, _, K, _ = weight.shape
    N = batch * cat
    P = h_out * w_out
    CKK = C * K * K
    out_dtype = jnp.dtype(x.dtype)
    cdt = jnp.dtype(compute_dtype) if compute_dtype is not None else out_dtype

    # --- glue: im2col / layout in plain JAX ---------------------------------
    # TODO(synk): fold im2col into the kernel (pass x with
    # BlockSpec(memory_space=pl.ANY) and do per-row-band pltpu.make_async_copy
    # into VMEM scratch) to avoid the K^2 duplication of input bytes that this
    # wrapper materializes in HBM.
    xr = x.reshape(N, C, H, W)
    if padding > 0:
        xr = jnp.pad(xr, ((0, 0), (0, 0), (padding, padding), (padding, padding)))

    # patches[p, n, c*K*K + ki*K + kj] = x_pad[n, c, i*s+ki, j*s+kj], p = i*w_out + j
    slices = []
    for ki in range(K):
        for kj in range(K):
            slices.append(
                xr[:, :, ki:ki + stride * h_out:stride, kj:kj + stride * w_out:stride])
    patches = jnp.stack(slices, axis=-1)                 # (N, C, h_out, w_out, K*K)
    patches = patches.transpose(2, 3, 0, 1, 4).reshape(P, N, CKK).astype(cdt)

    # weight[p, o, c*K*K + ki*K + kj] = weight[o, i, j, c, ki, kj] — contraction
    # dim is the shared LAST dim of both operands, so no 128-padding of OC/CKK.
    w_r = weight.transpose(1, 2, 0, 3, 4, 5).reshape(P, OC, CKK).astype(cdt)

    # bias -> (P, cat, OC) in f32; batch broadcast happens inside the kernel.
    b_r = bias.transpose(2, 3, 0, 1).reshape(P, cat, OC).astype(jnp.float32)

    # --- VMEM budget & tile choice ------------------------------------------
    vmem_cap = _vmem_capacity_bytes()
    if vmem_budget_bytes is None:
        vmem_budget_bytes = vmem_cap // 4        # headroom for Mosaic scratch
    vmem_limit = int(min((vmem_cap * 3) // 4, 96 * 1024 * 1024))

    per_p = (2 * _tiled_bytes(N, CKK, cdt)                 # patches (double-buffered)
             + 2 * _tiled_bytes(OC, CKK, cdt)              # weight
             + 2 * _tiled_bytes(cat, OC, jnp.float32)      # bias
             + 2 * _tiled_bytes(N, OC, out_dtype)          # output
             + _tiled_bytes(N, OC, jnp.float32)            # f32 accumulator temp
             + batch * _tiled_bytes(cat, OC, jnp.float32))  # bias-broadcast temp
    Pt = _choose_p_tile(P, per_p, vmem_budget_bytes)
    grid = (P // Pt,)

    # True (un-padded) flops / bytes.
    cost = pl.CostEstimate(
        flops=2 * P * N * CKK * OC,
        transcendentals=0,
        bytes_accessed=(P * N * CKK * cdt.itemsize
                        + P * OC * CKK * cdt.itemsize
                        + P * cat * OC * 4
                        + P * N * OC * out_dtype.itemsize))

    out = pl.pallas_call(
        functools.partial(_lc_kernel, batch=batch, cat=cat),
        out_shape=jax.ShapeDtypeStruct((P, N, OC), out_dtype),
        grid=grid,
        in_specs=[
            pl.BlockSpec((Pt, N, CKK), lambda p: (p, 0, 0)),
            pl.BlockSpec((Pt, OC, CKK), lambda p: (p, 0, 0)),
            pl.BlockSpec((Pt, cat, OC), lambda p: (p, 0, 0)),
        ],
        out_specs=pl.BlockSpec((Pt, N, OC), lambda p: (p, 0, 0)),
        compiler_params=pltpu.CompilerParams(
            dimension_semantics=("parallel",),
            vmem_limit_bytes=vmem_limit),
        cost_estimate=cost,
    )(patches, w_r, b_r)

    # (P, N, OC) -> (batch, category_dim, OC, h_out, w_out).  The output is now
    # the smallest stream (no OC padding), so this single transpose pass is
    # cheap and typically fused by XLA with its consumer.
    out = out.transpose(1, 2, 0).reshape(batch, cat, OC, h_out, w_out)
    return out


def _reference(x, weight, bias, *, stride=1, padding=0):
    """Pure-JAX reference (direct definition of locally-connected conv), f32."""
    batch, cat, C, H, W = x.shape
    OC, h_out, w_out, _, K, _ = weight.shape
    N = batch * cat
    xr = x.reshape(N, C, H, W)
    if padding > 0:
        xr = jnp.pad(xr, ((0, 0), (0, 0), (padding, padding), (padding, padding)))
    rows = []
    for i in range(h_out):
        cols = []
        for j in range(w_out):
            patch = xr[:, :, i * stride:i * stride + K, j * stride:j * stride + K]
            cols.append(jnp.einsum('ncab,ocab->no', patch, weight[:, i, j]))
        rows.append(jnp.stack(cols, axis=-1))            # (N, OC, w_out)
    out = jnp.stack(rows, axis=-2)                       # (N, OC, h_out, w_out)
    out = out.reshape(batch, cat, OC, h_out, w_out)
    return out + bias[None]


if __name__ == "__main__":
    # Small shapes consistent with the module's forward.
    batch, category_dim = 2, 4
    in_channels, out_channels = 4, 8
    h_in = w_in = 8
    kernel_size, stride, padding = 3, 1, 0
    h_out = int(np.floor((h_in + 2 * padding - kernel_size) / stride + 1))
    w_out = int(np.floor((w_in + 2 * padding - kernel_size) / stride + 1))

    key = jax.random.PRNGKey(0)
    kx, kw, kb = jax.random.split(key, 3)

    # Deterministic synthetic init (init_local approximated by a fan-in-scaled
    # normal; the module's bias starts at zero but a small random bias is used
    # so the bias-add path is exercised).
    fan_in = in_channels * kernel_size * kernel_size
    weight = jax.random.normal(
        kw, (out_channels, h_out, w_out, in_channels, kernel_size, kernel_size),
        dtype=jnp.float32) / np.sqrt(fan_in)
    bias = 0.1 * jax.random.normal(
        kb, (category_dim, out_channels, h_out, w_out), dtype=jnp.float32)
    x = jax.random.normal(
        kx, (batch, category_dim, in_channels, h_in, w_in), dtype=jnp.float32)

    fwd = jax.jit(functools.partial(local2d_forward, stride=stride, padding=padding))
    out = jax.block_until_ready(fwd(x, weight, bias))

    ref = jax.block_until_ready(
        _reference(x, weight, bias, stride=stride, padding=padding))

    assert out.shape == (batch, category_dim, out_channels, h_out, w_out)
    # bf16 matmul operands (f32 accumulate) -> tolerance loosened vs pure f32.
    np.testing.assert_allclose(np.asarray(out), np.asarray(ref), rtol=3e-2, atol=3e-2)

    # TODO(synk): custom_backward / post_step_callback (training-only paths) not implemented.
    print("KERNEL_OK")
</pallas_src>

<mosaic_0001>
module attributes {stable_mosaic.version = 11 : i64} {
  func.func @_lc_kernel(%arg0: i32, %arg1: memref<9x8x36xbf16, #tpu.memory_space<vmem>>, %arg2: memref<9x8x36xbf16, #tpu.memory_space<vmem>>, %arg3: memref<9x4x8xf32, #tpu.memory_space<vmem>>, %arg4: memref<9x8x8xf32, #tpu.memory_space<vmem>>) attributes {dimension_semantics = [#tpu.dimension_semantics<parallel>], iteration_bounds = array<i64: 4>, scalar_prefetch = 0 : i64, scratch_operands = 0 : i64, tpu.core_type = #tpu.core_type<tc>, window_params = [{transform_indices = @transform_0, window_bounds = array<i64: 9, 8, 36>}, {transform_indices = @transform_1, window_bounds = array<i64: 9, 8, 36>}, {transform_indices = @transform_2, window_bounds = array<i64: 9, 4, 8>}, {transform_indices = @transform_3, window_bounds = array<i64: 9, 8, 8>}]} {
    %c0 = arith.constant 0 : index
    %c0_0 = arith.constant 0 : index
    %c0_1 = arith.constant 0 : index
    %0 = vector.load %arg1[%c0, %c0_0, %c0_1] : memref<9x8x36xbf16, #tpu.memory_space<vmem>>, vector<9x8x36xbf16>
    %c0_2 = arith.constant 0 : index
    %c0_3 = arith.constant 0 : index
    %c0_4 = arith.constant 0 : index
    %1 = vector.load %arg2[%c0_2, %c0_3, %c0_4] : memref<9x8x36xbf16, #tpu.memory_space<vmem>>, vector<9x8x36xbf16>
    "tpu.trace_start"() <{level = 10 : i32, message = "pnc,poc->pno"}> : () -> ()
    %cst = arith.constant dense<0.000000e+00> : vector<9x8x8xf32>
    %2 = tpu.matmul %0, %1, %cst {dimension_numbers = #tpu.dot_dimension_numbers<[2], [2], [1], [1], [0, 0, 0, 1, 1, 1], [0], [0]>} : vector<9x8x36xbf16>, vector<9x8x36xbf16>, vector<9x8x8xf32> -> vector<9x8x8xf32>
    "tpu.trace_stop"() : () -> ()
    %c0_5 = arith.constant 0 : index
    %c0_6 = arith.constant 0 : index
    %c0_7 = arith.constant 0 : index
    %3 = vector.load %arg3[%c0_5, %c0_6, %c0_7] : memref<9x4x8xf32, #tpu.memory_space<vmem>>, vector<9x4x8xf32>
    %4 = vector.shape_cast %2 : vector<9x8x8xf32> to vector<9x2x4x8xf32>
    %5 = vector.shape_cast %3 : vector<9x4x8xf32> to vector<9x1x4x8xf32>
    %6 = vector.broadcast %5 : vector<9x1x4x8xf32> to vector<9x2x4x8xf32>
    %7 = arith.addf %4, %6 : vector<9x2x4x8xf32>
    %8 = vector.shape_cast %7 : vector<9x2x4x8xf32> to vector<9x8x8xf32>
    %c0_8 = arith.constant 0 : index
    %c0_9 = arith.constant 0 : index
    %c0_10 = arith.constant 0 : index
    %9 = vector.load %arg4[%c0_8, %c0_9, %c0_10] : memref<9x8x8xf32, #tpu.memory_space<vmem>>, vector<9x8x8xf32>
    tpu.vector_store %arg4[%c0_8, %c0_9, %c0_10], %8 {strides = array<i32>} : memref<9x8x8xf32, #tpu.memory_space<vmem>>, vector<9x8x8xf32>,
    return
  }
  func.func @transform_0(%arg0: i32) -> (i32, i32, i32) {
    %c0_i32 = arith.constant 0 : i32
    %c0_i32_0 = arith.constant 0 : i32
    %c0_i32_1 = arith.constant 0 : i32
    return %arg0, %c0_i32, %c0_i32_0 : i32, i32, i32
  }
  func.func @transform_1(%arg0: i32) -> (i32, i32, i32) {
    %c0_i32 = arith.constant 0 : i32
    %c0_i32_0 = arith.constant 0 : i32
    %c0_i32_1 = arith.constant 0 : i32
    return %arg0, %c0_i32, %c0_i32_0 : i32, i32, i32
  }
  func.func @transform_2(%arg0: i32) -> (i32, i32, i32) {
    %c0_i32 = arith.constant 0 : i32
    %c0_i32_0 = arith.constant 0 : i32
    %c0_i32_1 = arith.constant 0 : i32
    return %arg0, %c0_i32, %c0_i32_0 : i32, i32, i32
  }
  func.func @transform_3(%arg0: i32) -> (i32, i32, i32) {
    %c0_i32 = arith.constant 0 : i32
    %c0_i32_0 = arith.constant 0 : i32
    %c0_i32_1 = arith.constant 0 : i32
    return %arg0, %c0_i32, %c0_i32_0 : i32, i32, i32
  }
}

</mosaic_0001>

<bundles_post_ra>
// kernel: local2d_forward.1
= control target key start
LH: loop header
LB: loop body
LE: loop exit
PB: predicated region body
PF: predicated region fallthrough
CT: control target
= control target key end

     0   :  { %s964_s12 = smov 0   ;;  %s1094_s0 = inlined_call_operand.vmem [shape: bf16[36,8,36], index: 0, kind: input, shape index: {}]   ;;  %s1095_s1 = inlined_call_operand.vmem [shape: bf16[36,8,36], index: 1, kind: input, shape index: {}]   ;;  %s1096_s2 = inlined_call_operand.vmem [shape: f32[36,4,8], index: 2, kind: input, shape index: {}]   ;;  %s1097_s3 = inlined_call_operand.vmem [shape: f32[36,8,8], index: 3, kind: output, shape index: {}]  }
   0x1 LB: > { %s832_s13 = sadd.s32 4294967295, %s940_s12   ;;  %p836_p0 = scmp.ge.s32.totalorder %s940_s12, 1  ;;  %s940_s12 = sphi %s964_s12, %s13_s12  }
   0x2   : > { %p160_p1 = scmp.lt.s32.totalorder %s940_s12, 5 }
   0x4   : > { %p161_p2 = pnand %p836_p0, %p160_p1 }
   0x5   : > { %s194_s14 = smul.u32 (!%p161_p2), 9, %s832_s13  ;;  %v942_v0 = vmov (!%p161_p2), 0.0   ;;  %vm943_vm0 = vmmov (!%p161_p2), 0   ;;  %vm237_vm1 = vcmask (!%p161_p2), 293888   ;;  %vm742_vm2 = vcmask (!%p161_p2), 64512  }
   0x6   : > { %164 = sbr.rel (%p161_p2) target bundleno = 276 (0x114), region = 32  ;;  %870 = vmatprep.subr.bf16.mxu0 (!%p161_p2), %v942_v0  ;;  %876 = vmatprep.subr.bf16.mxu1 (!%p161_p2), %v942_v0 }
   0x7   : > { %p195_p3 = scmp.lt.s32.totalorder (!%p161_p2), %s194_s14, 35  ;;  %872 = vmatprep.mubr.msk.bf16.mxu0 (!%p161_p2), %vm943_vm0, %v942_v0  ;;  %878 = vmatprep.mubr.msk.bf16.mxu1 (!%p161_p2), %vm943_vm0, %v942_v0 }
   0xd   : > { %s1099_s14 = smov (!%p195_p3, %s194_s14), 35 }
   0xe   : > { %s981_s15 = sshll.u32 %s1099_s14, 2  ;;  %s840_s25 = sshll.u32 %s1099_s14, 3 }
   0xf   : > { %s987_s18 = scalar_lea.vmem %s1095_s1, %s981_s15  ;;  %s997_s21 = scalar_lea.vmem %s1094_s0, %s981_s15 }
  0x10   : > { %v228_v1 = vld [vmem:[%s987_s18] sm:$0xf]  ;;  %v229_v2 = vld [vmem:[%s987_s18 + $0x4] sm:$0xf]  ;;  %v230_v5 = vld [vmem:[%s987_s18 + $0x8] sm:$0xf]  ;;  %s1056_s24 = scalar_lea.vmem %s1096_s2, %s981_s15  ;;  %s1064_s28 = scalar_lea.vmem %s1097_s3, %s840_s25 }
  0x11   : > { %v242_v3 = vsel %vm237_vm1, %v228_v1, 0  ;;  %v288_v4 = vsel %vm237_vm1, %v229_v2, 0  ;;  %v231_v6 = vld [vmem:[%s987_s18 + $0xc] sm:$0xf]  ;;  %v219_v7 = vld [vmem:[%s997_s21] sm:$0xf] }
  0x12   : > { %871 = vmatpush3.bf16.xpose.msra.mxu0 %v242_v3  ;;  %877 = vmatpush3.bf16.xpose.msra.mxu1 %v288_v4  ;;  %v220_v8 = vld [vmem:[%s997_s21 + $0x4] sm:$0xf]  ;;  %v334_v9 = vsel %vm237_vm1, %v230_v5, 0  ;;  %v380_v10 = vsel %vm237_vm1, %v231_v6, 0  ;;  %v232_v11 = vld [vmem:[%s987_s18 + $0x10] sm:$0xf] }
  0x13   : > { %882 = vmatprep.subr.bf16.mxu0 %v942_v0  ;;  %888 = vmatprep.subr.bf16.mxu1 %v942_v0  ;;  %v233_v12 = vld [vmem:[%s987_s18 + $0x14] sm:$0xf]  ;;  %v221_v13 = vld [vmem:[%s997_s21 + $0x8] sm:$0xf]  ;;  %v426_v14 = vsel %vm237_vm1, %v232_v11, 0 }
  0x14   : > { %v222_v15 = vld [vmem:[%s997_s21 + $0xc] sm:$0xf]  ;;  %v472_v16 = vsel %vm237_vm1, %v233_v12, 0  ;;  %v234_v17 = vld [vmem:[%s987_s18 + $0x18] sm:$0xf] }
  0x15   : > { %v235_v18 = vld [vmem:[%s987_s18 + $0x1c] sm:$0xf]  ;;  %v223_v19 = vld [vmem:[%s997_s21 + $0x10] sm:$0xf]  ;;  %v518_v20 = vsel %vm237_vm1, %v234_v17, 0 }
  0x16   : > { %v224_v21 = vld [vmem:[%s997_s21 + $0x14] sm:$0xf]  ;;  %v564_v22 = vsel %vm237_vm1, %v235_v18, 0  ;;  %v236_v23 = vld [vmem:[%s987_s18 + $0x20] sm:$0xf] }
  0x17   : > { %v225_v24 = vld [vmem:[%s997_s21 + $0x18] sm:$0xf]  ;;  %v610_v25 = vsel %vm237_vm1, %v236_v23, 0  ;;  %v226_v26 = vld [vmem:[%s997_s21 + $0x1c] sm:$0xf] }
  0x18   : > { %v227_v27 = vld [vmem:[%s997_s21 + $0x20] sm:$0xf]  ;;  %v653_v29 = vld [vmem:[%s1056_s24 + $0x4] sm:$0xf]  ;;  %v654_v46 = vld [vmem:[%s1056_s24 + $0x8] sm:$0xf] }
  0x19   : > { %873 = vmatmul.mubr.msk.bf16.vlgmr.msra.gmra.mrb[0].mxu0 %vm237_vm1, %v219_v7  ;;  %879 = vmatmul.mubr.msk.bf16.vlgmr.msra.gmra.mrb[0].mxu1 %vm237_vm1, %v220_v8  ;;  %v652_v28 = vld [vmem:[%s1056_s24] sm:$0xf]  ;;  %v655_v47 = vld [vmem:[%s1056_s24 + $0xc] sm:$0xf]  ;;  %v657_v1 = vld [vmem:[%s1056_s24 + $0x14] sm:$0xf] }
  0x1a   : > { %883 = vmatpush3.bf16.xpose.msra.mxu0 %v334_v9  ;;  %884 = vmatprep.mubr.msk.bf16.mxu0 %vm943_vm0, %v942_v0  ;;  %v658_v18 = vld [vmem:[%s1056_s24 + $0x18] sm:$0xf] }
  0x1b   : > { %889 = vmatpush3.bf16.xpose.msra.mxu1 %v380_v10  ;;  %894 = vmatprep.subr.bf16.mxu0 %v942_v0 }
  0x1c   : > { %890 = vmatprep.mubr.msk.bf16.mxu1 %vm943_vm0, %v942_v0  ;;  %900 = vmatprep.subr.bf16.mxu1 %v942_v0 }
  0x21   : > { %885 = vmatmul.mubr.msk.bf16.vlgmr.msra.gmra.mrb[4].mxu0 %vm237_vm1, %v221_v13 }
  0x22   : > { %895 = vmatpush3.bf16.xpose.msra.mxu0 %v426_v14  ;;  %891 = vmatmul.mubr.msk.bf16.vlgmr.msra.gmra.mrb[4].mxu1 %vm237_vm1, %v222_v15 }
  0x23   : > { %896 = vmatprep.mubr.msk.bf16.mxu0 %vm943_vm0, %v942_v0  ;;  %901 = vmatpush3.bf16.xpose.msra.mxu1 %v472_v16 }
  0x24   : > { %906 = vmatprep.subr.bf16.mxu0 %v942_v0  ;;  %902 = vmatprep.mubr.msk.bf16.mxu1 %vm943_vm0, %v942_v0 }
  0x25   : > { %912 = vmatprep.subr.bf16.mxu1 %v942_v0 }
  0x29   : > { %897 = vmatmul.mubr.msk.bf16.vlgmr.msra.gmra.mrb[8].mxu0 %vm237_vm1, %v223_v19  ;;  %v659_v19 = vld [vmem:[%s1056_s24 + $0x1c] sm:$0xf] }
  0x2a   : > { %907 = vmatpush3.bf16.xpose.msra.mxu0 %v518_v20  ;;  %903 = vmatmul.mubr.msk.bf16.vlgmr.msra.gmra.mrb[8].mxu1 %vm237_vm1, %v224_v21 }
  0x2b   : > { %908 = vmatprep.mubr.msk.bf16.mxu0 %vm943_vm0, %v942_v0  ;;  %913 = vmatpush3.bf16.xpose.msra.mxu1 %v564_v22 }
  0x2c   : > { %918 = vmatprep.subr.bf16.mxu0 %v942_v0  ;;  %914 = vmatprep.mubr.msk.bf16.mxu1 %vm943_vm0, %v942_v0 }
  0x31   : > { %909 = vmatmul.mubr.msk.bf16.vlgmr.msra.gmra.mrb[12].mxu0 %vm237_vm1, %v225_v24 }
  0x32   : > { %919 = vmatpush3.bf16.xpose.msra.mxu0 %v610_v25  ;;  %915 = vmatmul.mubr.msk.bf16.vlgmr.msra.gmra.mrb[12].mxu1 %vm237_vm1, %v226_v26 }
  0x33   : > { %920 = vmatprep.mubr.msk.bf16.mxu0 %vm943_vm0, %v942_v0  ;;  %v656_v0 = vld [vmem:[%s1056_s24 + $0x10] sm:$0xf] }
  0x39   : > { %921 = vmatmul.mubr.msk.bf16.vlgmr.msra.gmra.mrb[16].mxu0 %vm237_vm1, %v227_v27 }
  0xec   : > { %v278_v30 = vpop.f32.mrb[0].mxu0  ;;  %v324_v31 = vpop.f32.mrb[0].mxu1 }
  0xed   : > { %v670_v32 = vcombine.high %v278_v30, %v278_v30  ;;  %v688_v33 = vadd.f32 %v652_v28, %v278_v30  ;;  %v874_v34 = vpop.f32.mrb[1].mxu0  ;;  %v671_v35 = vcombine.high %v324_v31, %v324_v31  ;;  %v690_v36 = vadd.f32 %v653_v29, %v324_v31  ;;  %v880_v37 = vpop.f32.mrb[1].mxu1 }
  0xee   : > { %v281_v38 = vpop.f32.mrb[2].mxu0  ;;  %v327_v39 = vpop.f32.mrb[2].mxu1 }
  0xef   : > { %v689_v40 = vadd.f32 %v670_v32, %v652_v28  ;;  %v875_v41 = vpop.f32.mrb[3].mxu0  ;;  %v691_v42 = vadd.f32 %v671_v35, %v653_v29  ;;  %v881_v43 = vpop.f32.mrb[3].mxu1 }
  0xf1   : > { %v724_v44 = vcombine.low %v688_v33, %v689_v40  ;;  %v725_v45 = vcombine.low %v690_v36, %v691_v42  ;;  %v660_v36 = vld [vmem:[%s1056_s24 + $0x20] sm:$0xf] }
  0xf3   : > { %743 = vst.msk [vmem:[%s1064_s28] sm:$0xff] %vm742_vm2, %v724_v44  ;;  %744 = vst.msk [vmem:[%s1064_s28 + $0x8] sm:$0xff] %vm742_vm2, %v725_v45 }
  0xf4   : > { %v370_v48 = vpop.f32.mrb[4].mxu0 }
  0xf5   : > { %v672_v49 = vcombine.high %v370_v48, %v370_v48  ;;  %v692_v50 = vadd.f32 %v654_v46, %v370_v48  ;;  %v886_v51 = vpop.f32.mrb[5].mxu0  ;;  %v416_v52 = vpop.f32.mrb[4].mxu1 }
  0xf6   : > { %v373_v53 = vpop.f32.mrb[6].mxu0  ;;  %v673_v54 = vcombine.high %v416_v52, %v416_v52  ;;  %v694_v55 = vadd.f32 %v655_v47, %v416_v52  ;;  %v892_v56 = vpop.f32.mrb[5].mxu1 }
  0xf7   : > { %v693_v57 = vadd.f32 %v672_v49, %v654_v46  ;;  %v887_v58 = vpop.f32.mrb[7].mxu0  ;;  %v419_v59 = vpop.f32.mrb[6].mxu1 }
  0xf8   : > { %v695_v60 = vadd.f32 %v673_v54, %v655_v47  ;;  %v893_v61 = vpop.f32.mrb[7].mxu1 }
  0xf9   : > { %v726_v62 = vcombine.low %v692_v50, %v693_v57 }
  0xfa   : > { %v727_v63 = vcombine.low %v694_v55, %v695_v60 }
  0xfb   : > { %745 = vst.msk [vmem:[%s1064_s28 + $0x10] sm:$0xff] %vm742_vm2, %v726_v62 }
  0xfc   : > { %746 = vst.msk [vmem:[%s1064_s28 + $0x18] sm:$0xff] %vm742_vm2, %v727_v63  ;;  %v462_v2 = vpop.f32.mrb[8].mxu0 }
  0xfd   : > { %v674_v3 = vcombine.high %v462_v2, %v462_v2  ;;  %v696_v4 = vadd.f32 %v656_v0, %v462_v2  ;;  %v898_v5 = vpop.f32.mrb[9].mxu0  ;;  %v508_v6 = vpop.f32.mrb[8].mxu1 }
  0xfe   : > { %v465_v7 = vpop.f32.mrb[10].mxu0  ;;  %v675_v8 = vcombine.high %v508_v6, %v508_v6  ;;  %v698_v9 = vadd.f32 %v657_v1, %v508_v6  ;;  %v904_v10 = vpop.f32.mrb[9].mxu1 }
  0xff   : > { %v697_v11 = vadd.f32 %v674_v3, %v656_v0  ;;  %v899_v12 = vpop.f32.mrb[11].mxu0  ;;  %v511_v13 = vpop.f32.mrb[10].mxu1 }
 0x100   : > { %v699_v14 = vadd.f32 %v675_v8, %v657_v1  ;;  %v905_v15 = vpop.f32.mrb[11].mxu1 }
 0x101   : > { %v728_v16 = vcombine.low %v696_v4, %v697_v11 }
 0x102   : > { %v729_v17 = vcombine.low %v698_v9, %v699_v14 }
 0x103   : > { %747 = vst.msk [vmem:[%s1064_s28 + $0x20] sm:$0xff] %vm742_vm2, %v728_v16 }
 0x104   : > { %748 = vst.msk [vmem:[%s1064_s28 + $0x28] sm:$0xff] %vm742_vm2, %v729_v17  ;;  %v554_v20 = vpop.f32.mrb[12].mxu0 }
 0x105   : > { %v676_v21 = vcombine.high %v554_v20, %v554_v20  ;;  %v700_v22 = vadd.f32 %v658_v18, %v554_v20  ;;  %v910_v23 = vpop.f32.mrb[13].mxu0  ;;  %v600_v24 = vpop.f32.mrb[12].mxu1 }
 0x106   : > { %v557_v25 = vpop.f32.mrb[14].mxu0  ;;  %v677_v26 = vcombine.high %v600_v24, %v600_v24  ;;  %v702_v27 = vadd.f32 %v659_v19, %v600_v24  ;;  %v916_v28 = vpop.f32.mrb[13].mxu1 }
 0x107   : > { %v701_v29 = vadd.f32 %v676_v21, %v658_v18  ;;  %v911_v30 = vpop.f32.mrb[15].mxu0  ;;  %v603_v31 = vpop.f32.mrb[14].mxu1 }
 0x108   : > { %v703_v32 = vadd.f32 %v677_v26, %v659_v19  ;;  %v917_v33 = vpop.f32.mrb[15].mxu1 }
 0x109   : > { %v730_v34 = vcombine.low %v700_v22, %v701_v29 }
 0x10a   : > { %v731_v35 = vcombine.low %v702_v27, %v703_v32 }
 0x10b   : > { %749 = vst.msk [vmem:[%s1064_s28 + $0x30] sm:$0xff] %vm742_vm2, %v730_v34 }
 0x10c   : > { %750 = vst.msk [vmem:[%s1064_s28 + $0x38] sm:$0xff] %vm742_vm2, %v731_v35  ;;  %v646_v37 = vpop.f32.mrb[16].mxu0 }
 0x10d   : > { %v678_v38 = vcombine.high %v646_v37, %v646_v37  ;;  %v704_v39 = vadd.f32 %v660_v36, %v646_v37  ;;  %v922_v40 = vpop.f32.mrb[17].mxu0 }
 0x10e   : > { %v649_v41 = vpop.f32.mrb[18].mxu0 }
 0x10f   : > { %v705_v42 = vadd.f32 %v678_v38, %v660_v36  ;;  %v923_v43 = vpop.f32.mrb[19].mxu0 }
 0x111   : > { %v732_v44 = vcombine.low %v704_v39, %v705_v42 }
 0x113   : > { %751 = vst.msk [vmem:[%s1064_s28 + $0x40] sm:$0xff] %vm742_vm2, %v732_v44 }
 0x114 PF: > { %s13_s12 = sadd.s32 1, %s940_s12  }
 0x115   : > { %p10_p4 = scmp.ge.s32.totalorder %s13_s12, 6  }
 0x117   :  { %12 = sbr.rel (!%p10_p4) target bundleno = 1 (0x1), region = 68 }

</bundles_post_ra>
